<compile_context>
chip_gen: v6e
topology: v6e:2x2x1
jax: 0.10.0
libtpu: 0.0.40
codegen_flags: <defaults>
</compile_context>

<pallas_src>
import jax
import jax.numpy as jnp
from jax.experimental import pallas as pl
from jax.experimental.pallas import tpu as pltpu


def _round_up(v: int, m: int) -> int:
    return ((v + m - 1) // m) * m


# ---------------------------------------------------------------------------
# Pallas matmul kernel: Y = X @ W  with the whole (padded) K inside one block.
# X: (tm, K) bf16, W: (K, tn) bf16, Y: (tm, tn) f32.  No reduction grid axis,
# so no accumulator scratch and no pl.when phases are needed.
# ---------------------------------------------------------------------------
def _matmul_kernel(x_ref, w_ref, o_ref):
    o_ref[...] = jnp.dot(
        x_ref[...], w_ref[...], preferred_element_type=jnp.float32
    ).astype(o_ref.dtype)


def pallas_patch_matmul(x, w, *, tm, tn):
    """x: (M, K) bf16, w: (K, N) bf16 -> (M, N) f32.  M % tm == 0, N % tn == 0,
    K a multiple of 128 (callers pad)."""
    M, K = x.shape
    K2, N = w.shape
    assert K == K2
    assert M % tm == 0 and N % tn == 0 and K % 128 == 0
    grid = (M // tm, N // tn)

    # VMEM budget: 2x double-buffered bf16 input blocks + 2x f32 output block.
    # Stays small (a few MiB) even for Llama3-MM shapes; explicit limit keeps
    # us honest on v7x's 64 MiB physical VMEM.
    vmem_need = 2 * (tm * K * 2) + 2 * (K * tn * 2) + 2 * (tm * tn * 4)
    vmem_limit = min(max(2 * vmem_need, 8 << 20), 64 << 20)

    return pl.pallas_call(
        _matmul_kernel,
        out_shape=jax.ShapeDtypeStruct((M, N), jnp.float32),
        grid_spec=pltpu.PrefetchScalarGridSpec(
            num_scalar_prefetch=0,
            grid=grid,
            in_specs=[
                pl.BlockSpec((tm, K), lambda i, j: (i, 0)),
                pl.BlockSpec((K, tn), lambda i, j: (0, j)),
            ],
            out_specs=pl.BlockSpec((tm, tn), lambda i, j: (i, j)),
        ),
        compiler_params=pltpu.CompilerParams(
            dimension_semantics=("parallel", "parallel"),
            vmem_limit_bytes=vmem_limit,
        ),
    )(x, w)


# ---------------------------------------------------------------------------
# Unfold (torch.nn.Unfold semantics): NCHW -> (B, L, C*kh*kw)
# flatten order inside each patch is (channel, kernel_row, kernel_col),
# matching torch's (B, C*kh*kw, L) followed by permute(0, 2, 1).
# ---------------------------------------------------------------------------
def unfold_nchw(x, kernel_size, stride):
    kh, kw = kernel_size
    sh, sw = stride
    B, C, H, W = x.shape
    oh = (H - kh) // sh + 1
    ow = (W - kw) // sw + 1

    if (kh, kw) == (sh, sw) and H % kh == 0 and W % kw == 0:
        # Non-overlapping patches (ViT case): pure reshape + transpose,
        # XLA fuses this into the copy feeding the matmul (no gathers).
        p = x.reshape(B, C, oh, kh, ow, kw)
        p = p.transpose(0, 2, 4, 1, 3, 5).reshape(B, oh * ow, C * kh * kw)
        return p

    # General (possibly overlapping) unfold: gather-based fallback.
    row_idx = jnp.arange(oh)[:, None] * sh + jnp.arange(kh)[None, :]  # (oh, kh)
    col_idx = jnp.arange(ow)[:, None] * sw + jnp.arange(kw)[None, :]  # (ow, kw)
    p = x[:, :, row_idx, :]                    # (B, C, oh, kh, W)
    p = p[:, :, :, :, col_idx]                 # (B, C, oh, kh, ow, kw)
    p = p.transpose(0, 2, 4, 1, 3, 5).reshape(B, oh * ow, C * kh * kw)
    return p


# ---------------------------------------------------------------------------
# Module equivalent
# ---------------------------------------------------------------------------
class ColumnParallelConv2dPatchPallas:
    def __init__(self, in_channels, out_channels, kernel_size, stride, bias=False,
                 *, key=None):
        if isinstance(kernel_size, int):
            kernel_size = (kernel_size, kernel_size)
        if isinstance(stride, int):
            stride = (stride, stride)
        assert not bias, "bias=False in the reference usage"
        self.kernel_size = kernel_size
        self.stride = stride
        self.in_features = in_channels * kernel_size[0] * kernel_size[1]
        self.out_features = out_channels

        # Deterministic init of the ColumnParallelLinear weight (out, in),
        # same shape as torch nn.Linear weight.  Kept in f32 as the "master".
        if key is None:
            key = jax.random.PRNGKey(0)
        bound = 1.0 / (self.in_features ** 0.5)
        self.weight = jax.random.uniform(
            key, (self.out_features, self.in_features),
            dtype=jnp.float32, minval=-bound, maxval=bound,
        )

        # Pre-transpose / pre-cast / pre-pad the weight ONCE:
        #   (out, in) -> (K_pad, N_pad) bf16, lane-dense on N.
        K, N = self.in_features, self.out_features
        self._tn = 256 if N >= 256 else 128
        self._K_pad = _round_up(K, 128)
        self._N_pad = _round_up(N, self._tn)
        w_t = self.weight.T.astype(jnp.bfloat16)                    # (K, N)
        self._w_packed = (
            jnp.zeros((self._K_pad, self._N_pad), jnp.bfloat16)
            .at[:K, :N].set(w_t)
        )

    def __call__(self, x):
        # x: (B, C, H, W)  float32
        B = x.shape[0]
        patches = unfold_nchw(x, self.kernel_size, self.stride)     # (B, L, K)
        L, K = patches.shape[1], patches.shape[2]
        M = B * L
        N = self.out_features

        # Tile M: 256 for real shapes, full (8-aligned) extent for tiny inputs.
        tm = 256 if M >= 256 else _round_up(M, 8)
        M_pad = _round_up(M, tm)

        # Pack activations: bf16 MXU operands, zero-pad M and K (exact).
        x2d = patches.reshape(M, K).astype(jnp.bfloat16)
        x_packed = (
            jnp.zeros((M_pad, self._K_pad), jnp.bfloat16)
            .at[:M, :K].set(x2d)
        )

        y_pad = pallas_patch_matmul(
            x_packed, self._w_packed, tm=tm, tn=self._tn
        )                                                           # (M_pad, N_pad) f32
        # TODO(synk): emit bf16 output directly if the downstream consumer tolerates it.
        y = y_pad[:M, :N].reshape(B, L, N)
        # gather_from_tensor_model_parallel_region: identity for world_size=1.
        return y


# ---------------------------------------------------------------------------
# Reference (pure JAX, f32) for sanity checking
# ---------------------------------------------------------------------------
def reference_forward(module, x):
    patches = unfold_nchw(x, module.kernel_size, module.stride)
    return jnp.einsum("blk,ok->blo", patches, module.weight)


if __name__ == "__main__":
    key = jax.random.PRNGKey(0)
    k_x, k_w = jax.random.split(key)

    # Small shapes consistent with the module's forward:
    # (num_stacked_chunks, in_channels, width, height) with ViT-style patching
    # (kernel_size == stride).
    B, C, H, W = 2, 4, 16, 16
    kernel_size, stride = 8, 8
    out_channels = 32

    x = jax.random.normal(k_x, (B, C, H, W), dtype=jnp.float32)

    module = ColumnParallelConv2dPatchPallas(
        in_channels=C, out_channels=out_channels,
        kernel_size=kernel_size, stride=stride, bias=False, key=k_w,
    )

    y = module(x)
    y = jax.block_until_ready(y)

    # Expected output shape: (B, num_tokens, out_channels) = (2, 4, 32)
    num_tokens = ((H - kernel_size) // stride + 1) * ((W - kernel_size) // stride + 1)
    assert y.shape == (B, num_tokens, out_channels), y.shape

    # bf16 operands (f32 accumulation) -> loosened tolerance vs f32 reference.
    y_ref = reference_forward(module, x)
    max_err = float(jnp.max(jnp.abs(y - y_ref)))
    assert jnp.allclose(y, y_ref, atol=5e-2, rtol=5e-2), max_err

    print("KERNEL_OK")
</pallas_src>

<mosaic_0001>
module attributes {stable_mosaic.version = 11 : i64} {
  func.func @_matmul_kernel(%arg0: i32, %arg1: i32, %arg2: memref<8x256xbf16, #tpu.memory_space<vmem>>, %arg3: memref<256x128xbf16, #tpu.memory_space<vmem>>, %arg4: memref<8x128xf32, #tpu.memory_space<vmem>>) attributes {dimension_semantics = [#tpu.dimension_semantics<parallel>, #tpu.dimension_semantics<parallel>], iteration_bounds = array<i64: 1, 1>, scalar_prefetch = 0 : i64, scratch_operands = 0 : i64, tpu.core_type = #tpu.core_type<tc>, window_params = [{transform_indices = @transform_0, window_bounds = array<i64: 8, 256>}, {transform_indices = @transform_1, window_bounds = array<i64: 256, 128>}, {transform_indices = @transform_2, window_bounds = array<i64: 8, 128>}]} {
    %c0 = arith.constant 0 : index
    %c0_0 = arith.constant 0 : index
    %0 = vector.load %arg2[%c0, %c0_0] : memref<8x256xbf16, #tpu.memory_space<vmem>>, vector<8x256xbf16>
    %c0_1 = arith.constant 0 : index
    %c0_2 = arith.constant 0 : index
    %1 = vector.load %arg3[%c0_1, %c0_2] : memref<256x128xbf16, #tpu.memory_space<vmem>>, vector<256x128xbf16>
    %cst = arith.constant dense<0.000000e+00> : vector<8x128xf32>
    %2 = tpu.matmul %0, %1, %cst {dimension_numbers = #tpu.dot_dimension_numbers<[1], [0], [0], [1], [0, 0, 1, 1], [], []>} : vector<8x256xbf16>, vector<256x128xbf16>, vector<8x128xf32> -> vector<8x128xf32>
    %c0_3 = arith.constant 0 : index
    %c0_4 = arith.constant 0 : index
    %3 = vector.load %arg4[%c0_3, %c0_4] : memref<8x128xf32, #tpu.memory_space<vmem>>, vector<8x128xf32>
    tpu.vector_store %arg4[%c0_3, %c0_4], %2 {strides = array<i32>} : memref<8x128xf32, #tpu.memory_space<vmem>>, vector<8x128xf32>,
    return
  }
  func.func @transform_0(%arg0: i32, %arg1: i32) -> (i32, i32) {
    %c0_i32 = arith.constant 0 : i32
    %c0_i32_0 = arith.constant 0 : i32
    return %arg0, %c0_i32 : i32, i32
  }
  func.func @transform_1(%arg0: i32, %arg1: i32) -> (i32, i32) {
    %c0_i32 = arith.constant 0 : i32
    %c0_i32_0 = arith.constant 0 : i32
    return %c0_i32, %arg1 : i32, i32
  }
  func.func @transform_2(%arg0: i32, %arg1: i32) -> (i32, i32) {
    %c0_i32 = arith.constant 0 : i32
    return %arg0, %arg1 : i32, i32
  }
}

</mosaic_0001>

<bundles_post_ra>
// kernel: tpu_custom_call.1
= control target key start
LH: loop header
LB: loop body
LE: loop exit
PB: predicated region body
PF: predicated region fallthrough
CT: control target
= control target key end

     0   :  { %7 = vsyncpa [#allocation3], 0  ;;  %s390_s0 = inlined_call_operand.hbm [shape: bf16[8,256], index: 0, kind: input, shape index: {}]   ;;  %s391_s1 = inlined_call_operand.hbm [shape: bf16[256,128], index: 1, kind: input, shape index: {}]   ;;  %s392_s2 = inlined_call_operand.hbm [shape: f32[8,128], index: 2, kind: output, shape index: {}]  }
   0x1   :  { %8 = vsyncpa [#allocation6], 0 }
   0x2   :  { %9 = vsyncpa [#allocation4], 0  ;;  %s361_s9 = smov [#allocation2]   ;;  %s362_s11 = smov [#allocation5]  }
   0x3   :  { %s16_s10 = sshll.u32 %s361_s9, 4  ;;  %s25_s12 = sshll.u32 %s362_s11, 4  ;;  %s17_s10 = int_to_ptr.vmem [resolvable:$true] %s16_s10  ;;  %s26_s12 = int_to_ptr.vmem [resolvable:$true] %s25_s12 }
   0x4   :  { %s303_s13 = scalar_lea.vmem %s17_s10, 128  ;;  %p308_p1 = scmp.lt.s32.totalorder %s17_s10, %s17_s10 }
   0x5   :  { %p304_p0 = scmp.ne.s32.totalorder %s17_s10, %s303_s13  ;;  %p309_p2 = scmp.lt.s32.totalorder %s303_s13, %s303_s13 }
   0x7   :  { %p310_p3 = por %p309_p2, %p308_p1 }
   0x9   :  { %p311_p4 = pnand %p310_p3, %p304_p0 }
   0xb   :  { %314 = shalt.err (!%p311_p4)
}
   0xc   :  { %19 = dma.hbm_to_vmem [thread:$0]  %s390_s0, 128, %s17_s10, [#allocation3]  }
   0xd   :  { %s323_s16 = scalar_lea.vmem %s26_s12, 2048  ;;  %p328_p6 = scmp.lt.s32.totalorder %s26_s12, %s26_s12 }
   0xe   :  { %p324_p5 = scmp.ne.s32.totalorder %s26_s12, %s323_s16  ;;  %p329_p7 = scmp.lt.s32.totalorder %s323_s16, %s323_s16 }
  0x10   :  { %p330_p8 = por %p329_p7, %p328_p6 }
  0x12   :  { %p331_p9 = pnand %p330_p8, %p324_p5 }
  0x14   :  { %334 = shalt.err (!%p331_p9)
}
  0x15   :  { %s363_s17 = smov 64   ;;  %s364_s18 = smov 4  }
  0x16   :  { %31 = dma.hbm_to_vmem [thread:$0]  %s391_s1, 2048, %s26_s12, [#allocation6], %s363_s17, %s363_s17, %s364_s18  }
  0x17   :  { %355 = dma.done.wait [#allocation3], 128  }
  0x18   :  { %356 = vsyncadd [#allocation3], 4294967168 }
  0x19   :  { %357 = dma.done.wait [#allocation6], 2048  }
  0x1a   :  { %358 = vsyncadd [#allocation6], 4294965248  ;;  %v277_v0 = vld [vmem:[#allocation5 + $0x78] sm:$0xff]   ;;  %v279_v2 = vld [vmem:[#allocation5 + $0x70] sm:$0xff]   ;;  %s365_s0 = smov [#allocation7]  }
  0x1b   :  { %v278_v1 = vld [vmem:[#allocation5 + $0x38] sm:$0xff]   ;;  %250 = vmatprep.subr.bf16.mxu0 %v277_v0  ;;  %v280_v3 = vld [vmem:[#allocation5 + $0x30] sm:$0xff]   ;;  %v281_v4 = vld [vmem:[#allocation5 + $0x68] sm:$0xff]   ;;  %s222_s1 = sshll.u32 %s365_s0, 4  ;;  %s223_s1 = int_to_ptr.vmem [resolvable:$true] %s222_s1 }
  0x1c   :  { %251 = vmatpush3.bf16.msra.mxu0 %v278_v1  ;;  %v282_v5 = vld [vmem:[#allocation5 + $0x28] sm:$0xff]   ;;  %v283_v6 = vld [vmem:[#allocation5 + $0x60] sm:$0xff]   ;;  %v285_v8 = vld [vmem:[#allocation5 + $0x58] sm:$0xff]   ;;  %s335_s21 = scalar_lea.vmem %s223_s1, 128  ;;  %p340_p11 = scmp.lt.s32.totalorder %s223_s1, %s223_s1 }
  0x1d   :  { %252 = vmatprep.subr.bf16.mxu0 %v279_v2  ;;  %v284_v7 = vld [vmem:[#allocation5 + $0x20] sm:$0xff]   ;;  %v286_v9 = vld [vmem:[#allocation5 + $0x18] sm:$0xff]   ;;  %v287_v10 = vld [vmem:[#allocation5 + $0x50] sm:$0xff]   ;;  %p336_p10 = scmp.ne.s32.totalorder %s223_s1, %s335_s21  ;;  %p341_p12 = scmp.lt.s32.totalorder %s335_s21, %s335_s21 }
  0x1e   :  { %v39_v11 = vld [vmem:[#allocation2] sm:$0xff]  ;;  %v288_v13 = vld [vmem:[#allocation5 + $0x10] sm:$0xff]   ;;  %v289_v14 = vld [vmem:[#allocation5 + $0x48] sm:$0xff]  }
  0x1f   :  { %v233_v12 = vcombine.high %v39_v11, %v39_v11  ;;  %v290_v15 = vld [vmem:[#allocation5 + $0x8] sm:$0xff]   ;;  %v291_v16 = vld [vmem:[#allocation5 + $0x40] sm:$0xff]   ;;  %v232_v18 = vcombine.low %v39_v11, %v39_v11  ;;  %p342_p13 = por %p341_p12, %p340_p11 }
  0x20   :  { %253 = vmatpush3.bf16.msra.mxu0 %v280_v3  ;;  %v292_v17 = vld [vmem:[#allocation5] sm:$0xff]  }
  0x21   :  { %254 = vmatprep.subr.bf16.mxu0 %v281_v4  ;;  %207 = vmatprep.mubr.bf16.mxu0 %v233_v12  ;;  %p343_p0 = pnand %p342_p13, %p336_p10 }
  0x24   :  { %255 = vmatpush3.bf16.msra.mxu0 %v282_v5 }
  0x25   :  { %256 = vmatprep.subr.bf16.mxu0 %v283_v6 }
  0x28   :  { %257 = vmatpush3.bf16.msra.mxu0 %v284_v7 }
  0x29   :  { %258 = vmatprep.subr.bf16.mxu0 %v285_v8 }
  0x2c   :  { %259 = vmatpush3.bf16.msra.mxu0 %v286_v9 }
  0x2d   :  { %260 = vmatprep.subr.bf16.mxu0 %v287_v10 }
  0x30   :  { %261 = vmatpush3.bf16.msra.mxu0 %v288_v13 }
  0x31   :  { %262 = vmatprep.subr.bf16.mxu0 %v289_v14 }
  0x34   :  { %263 = vmatpush3.bf16.msra.mxu0 %v290_v15 }
  0x35   :  { %264 = vmatprep.subr.bf16.mxu0 %v291_v16 }
  0x38   :  { %265 = vmatpush3.bf16.msra.mxu0 %v292_v17 }
  0x3b   :  { %208 = vmatmul.mubr.bf16.vlgmr.msra.gmra.mxu0 %v232_v18 }
  0xfb   :  { %v266_v19 = vpop.f32.mrf.mxu0 }
  0xfd   :  { %v267_v20 = vpop.f32.mrf.mxu0 }
  0xfe   :  { %v268_v21 = vadd.f32 %v267_v20, %v266_v19 }
  0xff   :  { %v269_v22 = vpop.f32.mrf.mxu0 }
 0x100   :  { %215 = vst [vmem:[#allocation7] sm:$0xff] %v268_v21 }
 0x101   :  { %v270_v23 = vpop.f32.mrf.mxu0 }
 0x102   :  { %346 = shalt.err (!%p343_p0)
}
 0x103   :  { %225 = dma.vmem_to_hbm [thread:$0]  %s223_s1, 128, %s392_s2, [#allocation4]  }
 0x104   :  { %359 = dma.done.wait [#allocation4], 128  }
 0x105   :  { %360 = vsyncadd [#allocation4], 4294967168 }
 0x106   :  { %229 = vsyncpa [#allocation3], 1 }
 0x107   :  { %230 = vsyncpa [#allocation6], 1 }
 0x108   :  { %231 = vsyncpa [#allocation4], 1 }

</bundles_post_ra>
